<compile_context>
chip_gen: v5e
topology: v5e:2x2
jax: 0.10.0
libtpu: 0.0.40
codegen_flags: <defaults>
</compile_context>

<pallas_src>
import jax
import jax.numpy as jnp
from jax.experimental import pallas as pl
from jax.experimental.pallas import tpu as pltpu

P_DROP = 0.25
_KEEP_SCALE = 1.0 / (1.0 - P_DROP)
_DROP_THRESH = int(P_DROP * (2 ** 32))          # P(bits < thresh) == P_DROP


def _dropout(h, bits):
    """Inverted dropout from raw uint32 bits via an integer threshold compare."""
    keep = bits >= jnp.uint32(_DROP_THRESH)
    return jnp.where(keep, h * jnp.float32(_KEEP_SCALE), jnp.float32(0.0))


def d_net_gauss_kernel(x_ref,                     # (TB, z_dim)  f32
                       bits1_ref, bits2_ref,      # (TB, N)      uint32
                       w1_ref, b1_ref,            # (z_dim, N) bf16, (1, N) f32
                       w2_ref, b2_ref,            # (N, N)   bf16, (1, N) f32
                       w3_ref,                    # (1, N)   bf16  (PyTorch layout)
                       b3_ref,                    # (1,)     f32   in SMEM
                       out_ref):                  # (1, TB)  f32   (lane-dense)
    # lin1 -> dropout -> relu   (bf16 MXU operands, f32 accumulate / elementwise)
    h = jnp.dot(x_ref[...].astype(jnp.bfloat16), w1_ref[...],
                preferred_element_type=jnp.float32) + b1_ref[...]
    h = jnp.maximum(_dropout(h, bits1_ref[...]), 0.0)

    # lin2 -> dropout -> relu
    h = jnp.dot(h.astype(jnp.bfloat16), w2_ref[...],
                preferred_element_type=jnp.float32) + b2_ref[...]
    h = jnp.maximum(_dropout(h, bits2_ref[...]), 0.0)

    # lin3 -> sigmoid. Contract w3 (1, N) against h's feature axis -> (1, TB),
    # so the stored output block is lane-dense (no masked (TB,1) column stores).
    logit = jax.lax.dot_general(
        w3_ref[...], h.astype(jnp.bfloat16),
        dimension_numbers=(((1,), (1,)), ((), ())),
        preferred_element_type=jnp.float32) + b3_ref[0]
    out_ref[...] = jax.nn.sigmoid(logit).astype(out_ref.dtype)


def d_net_gauss_forward(x, params, dropout_key, *, tb=None):
    """x: (B, z_dim) f32. params: dict from init_params. dropout_key: PRNG key
    (split it per training step so dropout masks differ across steps)."""
    B, z_dim = x.shape
    N = params["w1"].shape[1]
    if tb is None:
        tb = min(B, 256)                      # batch tile; small enough for v7x VMEM
    grid = (pl.cdiv(B, tb),)

    k1, k2 = jax.random.split(dropout_key)
    bits1 = jax.random.bits(k1, (B, N), dtype=jnp.uint32)
    bits2 = jax.random.bits(k2, (B, N), dtype=jnp.uint32)

    def row_spec(cols):                       # tiled over batch rows
        return pl.BlockSpec((tb, cols), lambda i: (i, 0))

    def const_spec(shape):                    # resident weights / biases
        return pl.BlockSpec(shape, lambda i: (0, 0))

    flops = 2 * B * (z_dim * N + N * N + N)
    bytes_accessed = (x.size * 4 + bits1.size * 4 + bits2.size * 4
                      + (z_dim * N + N * N + N) * 2       # bf16 weights
                      + (2 * N + 1) * 4 + B * 4)

    out = pl.pallas_call(
        d_net_gauss_kernel,
        out_shape=jax.ShapeDtypeStruct((1, B), jnp.float32),
        grid_spec=pltpu.PrefetchScalarGridSpec(
            num_scalar_prefetch=0,
            grid=grid,
            in_specs=[
                row_spec(z_dim),                                   # x
                row_spec(N),                                       # bits1
                row_spec(N),                                       # bits2
                const_spec((z_dim, N)),                            # w1
                const_spec((1, N)),                                # b1
                const_spec((N, N)),                                # w2
                const_spec((1, N)),                                # b2
                const_spec((1, N)),                                # w3 (out=1, in=N)
                pl.BlockSpec(memory_space=pltpu.MemorySpace.SMEM), # b3 scalar
            ],
            out_specs=pl.BlockSpec((1, tb), lambda i: (0, i)),
        ),
        compiler_params=pltpu.CompilerParams(
            dimension_semantics=("parallel",),
            vmem_limit_bytes=32 * 1024 * 1024),
        cost_estimate=pl.CostEstimate(flops=flops, transcendentals=B,
                                      bytes_accessed=bytes_accessed),
    )(x, bits1, bits2,
      params["w1"], params["b1"], params["w2"], params["b2"],
      params["w3"], params["b3"])

    return out.reshape(B, 1)                  # back to PyTorch's (B, 1) output


def init_params(key, z_dim, N):
    """nn.Linear-style U(-1/sqrt(fan_in), 1/sqrt(fan_in)) init; weights stored bf16."""
    ks = jax.random.split(key, 6)

    def lin(kw, kb, fan_in, fan_out):
        bound = 1.0 / (fan_in ** 0.5)
        w = jax.random.uniform(kw, (fan_in, fan_out), jnp.float32, -bound, bound)
        b = jax.random.uniform(kb, (1, fan_out), jnp.float32, -bound, bound)
        return w, b

    w1, b1 = lin(ks[0], ks[1], z_dim, N)
    w2, b2 = lin(ks[2], ks[3], N, N)
    w3, b3 = lin(ks[4], ks[5], N, 1)
    return {
        "w1": w1.astype(jnp.bfloat16), "b1": b1,
        "w2": w2.astype(jnp.bfloat16), "b2": b2,
        "w3": w3.T.astype(jnp.bfloat16),      # (1, N): PyTorch lin3.weight layout
        "b3": b3.reshape(1),                  # (1,) scalar for SMEM
    }


if __name__ == "__main__":
    B, Z_DIM, N = 8, 8, 32

    key = jax.random.PRNGKey(0)
    k_params, k_x, k_drop = jax.random.split(key, 3)

    params = init_params(k_params, Z_DIM, N)
    x = jax.random.normal(k_x, (B, Z_DIM), dtype=jnp.float32)

    out = d_net_gauss_forward(x, params, k_drop)
    out = jax.block_until_ready(out)

    assert out.shape == (B, 1) and out.dtype == jnp.float32
    assert bool(jnp.all(jnp.isfinite(out))) and bool(jnp.all((out >= 0) & (out <= 1)))
    print("KERNEL_OK")
</pallas_src>

<mosaic_0001>
module attributes {stable_mosaic.version = 11 : i64} {
  func.func @d_net_gauss_kernel(%arg0: i32, %arg1: memref<8x8xf32, #tpu.memory_space<vmem>>, %arg2: memref<8x32xi32, #tpu.memory_space<vmem>>, %arg3: memref<8x32xi32, #tpu.memory_space<vmem>>, %arg4: memref<8x32xbf16, #tpu.memory_space<vmem>>, %arg5: memref<1x32xf32, #tpu.memory_space<vmem>>, %arg6: memref<32x32xbf16, #tpu.memory_space<vmem>>, %arg7: memref<1x32xf32, #tpu.memory_space<vmem>>, %arg8: memref<1x32xbf16, #tpu.memory_space<vmem>>, %arg9: memref<1xf32, #tpu.memory_space<smem>>, %arg10: memref<1x8xf32, #tpu.memory_space<vmem>>) attributes {dimension_semantics = [#tpu.dimension_semantics<parallel>], iteration_bounds = array<i64: 1>, scalar_prefetch = 0 : i64, scratch_operands = 0 : i64, tpu.core_type = #tpu.core_type<tc>, window_params = [{transform_indices = @transform_0, window_bounds = array<i64: 8, 8>}, {transform_indices = @transform_1, window_bounds = array<i64: 8, 32>}, {transform_indices = @transform_2, window_bounds = array<i64: 8, 32>}, {pipeline_mode = #tpu.pipeline_mode<synchronous>, transform_indices = @transform_3, window_bounds = array<i64: 8, 32>}, {pipeline_mode = #tpu.pipeline_mode<synchronous>, transform_indices = @transform_4, window_bounds = array<i64: 1, 32>}, {pipeline_mode = #tpu.pipeline_mode<synchronous>, transform_indices = @transform_5, window_bounds = array<i64: 32, 32>}, {pipeline_mode = #tpu.pipeline_mode<synchronous>, transform_indices = @transform_6, window_bounds = array<i64: 1, 32>}, {pipeline_mode = #tpu.pipeline_mode<synchronous>, transform_indices = @transform_7, window_bounds = array<i64: 1, 32>}, {transform_indices = @transform_8, window_bounds = array<i64: 1>}, {transform_indices = @transform_9, window_bounds = array<i64: 1, 8>}]} {
    %c0 = arith.constant 0 : index
    %c0_0 = arith.constant 0 : index
    %0 = vector.load %arg1[%c0, %c0_0] : memref<8x8xf32, #tpu.memory_space<vmem>>, vector<8x8xf32>
    %1 = arith.truncf %0 : vector<8x8xf32> to vector<8x8xbf16>
    %c0_1 = arith.constant 0 : index
    %c0_2 = arith.constant 0 : index
    %2 = vector.load %arg4[%c0_1, %c0_2] : memref<8x32xbf16, #tpu.memory_space<vmem>>, vector<8x32xbf16>
    %cst = arith.constant dense<0.000000e+00> : vector<8x32xf32>
    %3 = tpu.matmul %1, %2, %cst {dimension_numbers = #tpu.dot_dimension_numbers<[1], [0], [0], [1], [0, 0, 1, 1], [], []>} : vector<8x8xbf16>, vector<8x32xbf16>, vector<8x32xf32> -> vector<8x32xf32>
    %c0_3 = arith.constant 0 : index
    %c0_4 = arith.constant 0 : index
    %4 = vector.load %arg5[%c0_3, %c0_4] : memref<1x32xf32, #tpu.memory_space<vmem>>, vector<1x32xf32>
    %5 = vector.broadcast %4 : vector<1x32xf32> to vector<8x32xf32>
    %6 = arith.addf %3, %5 : vector<8x32xf32>
    %c0_5 = arith.constant 0 : index
    %c0_6 = arith.constant 0 : index
    %7 = vector.load %arg2[%c0_5, %c0_6] : memref<8x32xi32, #tpu.memory_space<vmem>>, vector<8x32xi32>
    %c1073741824_i32 = arith.constant 1073741824 : i32
    %8 = vector.broadcast %c1073741824_i32 : i32 to vector<8x32xi32>
    %9 = arith.cmpi uge, %7, %8 : vector<8x32xi32>
    %cst_7 = arith.constant 1.33333337 : f32
    %10 = vector.broadcast %cst_7 : f32 to vector<8x32xf32>
    %11 = arith.mulf %6, %10 : vector<8x32xf32>
    %cst_8 = arith.constant 0.000000e+00 : f32
    %12 = vector.broadcast %cst_8 : f32 to vector<8x32xf32>
    %13 = arith.select %9, %11, %12 : vector<8x32xi1>, vector<8x32xf32>
    %cst_9 = arith.constant 0.000000e+00 : f32
    %14 = vector.broadcast %cst_9 : f32 to vector<8x32xf32>
    %15 = arith.maximumf %13, %14 : vector<8x32xf32>
    %16 = arith.truncf %15 : vector<8x32xf32> to vector<8x32xbf16>
    %c0_10 = arith.constant 0 : index
    %c0_11 = arith.constant 0 : index
    %17 = vector.load %arg6[%c0_10, %c0_11] : memref<32x32xbf16, #tpu.memory_space<vmem>>, vector<32x32xbf16>
    %cst_12 = arith.constant dense<0.000000e+00> : vector<8x32xf32>
    %18 = tpu.matmul %16, %17, %cst_12 {dimension_numbers = #tpu.dot_dimension_numbers<[1], [0], [0], [1], [0, 0, 1, 1], [], []>} : vector<8x32xbf16>, vector<32x32xbf16>, vector<8x32xf32> -> vector<8x32xf32>
    %c0_13 = arith.constant 0 : index
    %c0_14 = arith.constant 0 : index
    %19 = vector.load %arg7[%c0_13, %c0_14] : memref<1x32xf32, #tpu.memory_space<vmem>>, vector<1x32xf32>
    %20 = vector.broadcast %19 : vector<1x32xf32> to vector<8x32xf32>
    %21 = arith.addf %18, %20 : vector<8x32xf32>
    %c0_15 = arith.constant 0 : index
    %c0_16 = arith.constant 0 : index
    %22 = vector.load %arg3[%c0_15, %c0_16] : memref<8x32xi32, #tpu.memory_space<vmem>>, vector<8x32xi32>
    %c1073741824_i32_17 = arith.constant 1073741824 : i32
    %23 = vector.broadcast %c1073741824_i32_17 : i32 to vector<8x32xi32>
    %24 = arith.cmpi uge, %22, %23 : vector<8x32xi32>
    %cst_18 = arith.constant 1.33333337 : f32
    %25 = vector.broadcast %cst_18 : f32 to vector<8x32xf32>
    %26 = arith.mulf %21, %25 : vector<8x32xf32>
    %cst_19 = arith.constant 0.000000e+00 : f32
    %27 = vector.broadcast %cst_19 : f32 to vector<8x32xf32>
    %28 = arith.select %24, %26, %27 : vector<8x32xi1>, vector<8x32xf32>
    %cst_20 = arith.constant 0.000000e+00 : f32
    %29 = vector.broadcast %cst_20 : f32 to vector<8x32xf32>
    %30 = arith.maximumf %28, %29 : vector<8x32xf32>
    %c0_21 = arith.constant 0 : index
    %c0_22 = arith.constant 0 : index
    %31 = vector.load %arg8[%c0_21, %c0_22] : memref<1x32xbf16, #tpu.memory_space<vmem>>, vector<1x32xbf16>
    %32 = arith.truncf %30 : vector<8x32xf32> to vector<8x32xbf16>
    %cst_23 = arith.constant dense<0.000000e+00> : vector<1x8xf32>
    %33 = tpu.matmul %31, %32, %cst_23 {dimension_numbers = #tpu.dot_dimension_numbers<[1], [1], [0], [0], [0, 0, 1, 0], [], []>} : vector<1x32xbf16>, vector<8x32xbf16>, vector<1x8xf32> -> vector<1x8xf32>
    %c0_24 = arith.constant 0 : index
    %34 = memref.load %arg9[%c0_24] : memref<1xf32, #tpu.memory_space<smem>>
    %35 = vector.broadcast %34 : f32 to vector<1x8xf32>
    %36 = arith.addf %33, %35 : vector<1x8xf32>
    %37 = arith.negf %36 : vector<1x8xf32>
    %38 = math.exp %37 : vector<1x8xf32>
    %cst_25 = arith.constant 1.000000e+00 : f32
    %39 = vector.broadcast %cst_25 : f32 to vector<1x8xf32>
    %40 = arith.addf %39, %38 : vector<1x8xf32>
    %41 = arith.divf %39, %40 : vector<1x8xf32>
    %c0_26 = arith.constant 0 : index
    %c0_27 = arith.constant 0 : index
    %42 = vector.load %arg10[%c0_26, %c0_27] : memref<1x8xf32, #tpu.memory_space<vmem>>, vector<1x8xf32>
    tpu.vector_store %arg10[%c0_26, %c0_27], %41 {strides = array<i32>} : memref<1x8xf32, #tpu.memory_space<vmem>>, vector<1x8xf32>,
    return
  }
  func.func @transform_0(%arg0: i32) -> (i32, i32) {
    %c0_i32 = arith.constant 0 : i32
    %c0_i32_0 = arith.constant 0 : i32
    return %arg0, %c0_i32 : i32, i32
  }
  func.func @transform_1(%arg0: i32) -> (i32, i32) {
    %c0_i32 = arith.constant 0 : i32
    %c0_i32_0 = arith.constant 0 : i32
    return %arg0, %c0_i32 : i32, i32
  }
  func.func @transform_2(%arg0: i32) -> (i32, i32) {
    %c0_i32 = arith.constant 0 : i32
    %c0_i32_0 = arith.constant 0 : i32
    return %arg0, %c0_i32 : i32, i32
  }
  func.func @transform_3(%arg0: i32) -> (i32, i32) {
    %c0_i32 = arith.constant 0 : i32
    %c0_i32_0 = arith.constant 0 : i32
    %c0_i32_1 = arith.constant 0 : i32
    return %c0_i32, %c0_i32_0 : i32, i32
  }
  func.func @transform_4(%arg0: i32) -> (i32, i32) {
    %c0_i32 = arith.constant 0 : i32
    %c0_i32_0 = arith.constant 0 : i32
    %c0_i32_1 = arith.constant 0 : i32
    return %c0_i32, %c0_i32_0 : i32, i32
  }
  func.func @transform_5(%arg0: i32) -> (i32, i32) {
    %c0_i32 = arith.constant 0 : i32
    %c0_i32_0 = arith.constant 0 : i32
    %c0_i32_1 = arith.constant 0 : i32
    return %c0_i32, %c0_i32_0 : i32, i32
  }
  func.func @transform_6(%arg0: i32) -> (i32, i32) {
    %c0_i32 = arith.constant 0 : i32
    %c0_i32_0 = arith.constant 0 : i32
    %c0_i32_1 = arith.constant 0 : i32
    return %c0_i32, %c0_i32_0 : i32, i32
  }
  func.func @transform_7(%arg0: i32) -> (i32, i32) {
    %c0_i32 = arith.constant 0 : i32
    %c0_i32_0 = arith.constant 0 : i32
    %c0_i32_1 = arith.constant 0 : i32
    return %c0_i32, %c0_i32_0 : i32, i32
  }
  func.func @transform_8(%arg0: i32) -> i32 {
    %c0_i32 = arith.constant 0 : i32
    %c0_i32_0 = arith.constant 0 : i32
    return %c0_i32 : i32
  }
  func.func @transform_9(%arg0: i32) -> (i32, i32) {
    %c0_i32 = arith.constant 0 : i32
    %c0_i32_0 = arith.constant 0 : i32
    return %c0_i32, %arg0 : i32, i32
  }
}

</mosaic_0001>

<bundles_post_ra>
// kernel: tpu_custom_call.1
= control target key start
LH: loop header
LB: loop body
LE: loop exit
PB: predicated region body
PF: predicated region fallthrough
CT: control target
= control target key end

     0   :  { %15 = vsyncpa [#allocation4], 0  ;;  %s482_s0 = inlined_call_operand.hbm [shape: f32[8,8], index: 0, kind: input, shape index: {}]   ;;  %s483_s1 = inlined_call_operand.hbm [shape: u32[8,32], index: 1, kind: input, shape index: {}]   ;;  %s484_s2 = inlined_call_operand.hbm [shape: u32[8,32], index: 2, kind: input, shape index: {}]   ;;  %s485_s3 = inlined_call_operand.vmem [shape: bf16[8,32], index: 3, kind: input, shape index: {}]   ;;  %s486_s4 = inlined_call_operand.vmem [shape: f32[1,32], index: 4, kind: input, shape index: {}]   ;;  %s487_s5 = inlined_call_operand.hbm [shape: bf16[32,32], index: 5, kind: input, shape index: {}]   ;;  %s488_s6 = inlined_call_operand.vmem [shape: f32[1,32], index: 6, kind: input, shape index: {}]   ;;  %s489_s7 = inlined_call_operand.vmem [shape: bf16[1,32], index: 7, kind: input, shape index: {}]   ;;  %s490_s8 = inlined_call_operand.<no memory space> [shape: f32[1], index: 8, kind: input, shape index: {}]   ;;  %s491_s9 = inlined_call_operand.hbm [shape: f32[1,8], index: 9, kind: output, shape index: {}]  }
   0x1   :  { %16 = vsyncpa [#allocation7], 0 }
   0x2   :  { %17 = vsyncpa [#allocation10], 0  ;;  %s35_s11 = sshll.u32 %s483_s1, 4  ;;  %s36_s11 = int_to_ptr.hbm [resolvable:$true] %s35_s11 }
   0x3   :  { %18 = vsyncpa [#allocation5], 0  ;;  %s392_s12 = smov [#allocation6]   ;;  %s24_s16 = sshll.u32 %s482_s0, 4  ;;  %s25_s16 = int_to_ptr.hbm [resolvable:$true] %s24_s16 }
   0x4   :  { %s37_s13 = sshll.u32 %s392_s12, 4  ;;  %s393_s17 = smov [#allocation3]   ;;  %s38_s13 = int_to_ptr.vmem [resolvable:$true] %s37_s13 }
   0x5   :  { %40 = dma.hbm_to_vmem [thread:$0]  %s36_s11, 128, %s38_s13, [#allocation7]  }
   0x6   :  { %s26_s18 = sshll.u32 %s393_s17, 4  ;;  %s46_s21 = sshll.u32 %s484_s2, 4  ;;  %s27_s18 = int_to_ptr.vmem [resolvable:$true] %s26_s18  ;;  %s47_s21 = int_to_ptr.hbm [resolvable:$true] %s46_s21 }
   0x7   :  { %29 = dma.hbm_to_vmem [thread:$0]  %s25_s16, 128, %s27_s18, [#allocation4]  }
   0x8   :  { %s60_s23 = sshll.u32 %s487_s5, 4  ;;  %s394_s24 = smov [#allocation8]   ;;  %s61_s23 = int_to_ptr.hbm [resolvable:$true] %s60_s23 }
   0x9   :  { %s48_s25 = sshll.u32 %s394_s24, 4  ;;  %s395_s0 = smov [#allocation9]   ;;  %s49_s25 = int_to_ptr.vmem [resolvable:$true] %s48_s25 }
   0xa   :  { %51 = dma.hbm_to_vmem [thread:$0]  %s47_s21, 128, %s49_s25, [#allocation7]  }
   0xb   :  { %s62_s26 = sshll.u32 %s395_s0, 4  ;;  %s396_s27 = smov 64   ;;  %s63_s26 = int_to_ptr.vmem [resolvable:$true] %s62_s26 }
   0xc   :  { %s397_s28 = smov 4  }
   0xd   :  { %68 = dma.hbm_to_vmem [thread:$0]  %s61_s23, 256, %s63_s26, [#allocation10], %s396_s27, %s396_s27, %s397_s28  }
   0xe   :  { %384 = dma.done.wait [#allocation4], 128  }
   0xf   :  { %385 = vsyncadd [#allocation4], 4294967168 }
  0x10   :  { %386 = dma.done.wait [#allocation7], 256  }
  0x11   :  { %387 = vsyncadd [#allocation7], 4294967040 }
  0x12   :  { %388 = dma.done.wait [#allocation10], 256  }
  0x13   :  { %389 = vsyncadd [#allocation10], 4294967040  ;;  %vm103_vm0 = vcmask 1043456   ;;  %v94_v0 = vld [vmem:[%s485_s3] sm:$0xf]  ;;  %vm99_vm1 = vcmask 64512   ;;  %v175_v28 = vstv %s490_s8 }
  0x14   :  { %v92_v1 = vld [vmem:[#allocation3] sm:$0xff]  ;;  %v105_v2 = vsel %vm103_vm0, %v94_v0, 0  ;;  %v249_v5 = vld [vmem:[#allocation9] sm:$0xff]  ;;  %v120_v6 = vld [vmem:[#allocation6] sm:$0xff]  ;;  %vm148_vm3 = vcmask 261120   ;;  %s223_s8 = sshll.u32 %s491_s9, 4  ;;  %s224_s8 = int_to_ptr.hbm [resolvable:$true] %s223_s8 }
  0x15   :  { %v93_v3 = vpack.c.bf16 %v92_v1, %v92_v1  ;;  %114 = vmatpush.bf16.msra.mxu0 %v105_v2  ;;  %v250_v4 = vld [vmem:[#allocation9 + $0x8] sm:$0xff]  ;;  %v236_v8 = vxor.u32 2147483648, %v120_v6  ;;  %v165_v16 = vld [vmem:[#allocation8] sm:$0xff]  ;;  %vm214_vm8 = vcmask 57344  }
  0x16   :  { %158 = vmatpush.bf16.msra.mxu1 %v250_v4  ;;  %v258_v7 = vld [vmem:[%s486_s4] ss:$0 sm:$0xff]  ;;  %v246_v18 = vxor.u32 2147483648, %v165_v16 }
  0x17   :  { %vm123_vm2 = vcmp.ge.s32.totalorder %v236_v8, 3221225472  ;;  %v259_v17 = vld [vmem:[%s488_s6] ss:$0 sm:$0xff] }
  0x18   :  { %235 = vmatmul.msk.bf16.vlgmr.msra.gmra.mxu0 %vm99_vm1, %v93_v3  ;;  %vm168_vm4 = vcmp.ge.s32.totalorder %v246_v18, 3221225472  ;;  %v172_v27 = vld [vmem:[%s489_s7] sm:$0x1]  ;;  %s398_s7 = smov [#allocation11]  }
  0x19   :  { %s221_s13 = sshll.u32 %s398_s7, 4  ;;  %s222_s13 = int_to_ptr.vmem [resolvable:$true] %s221_s13 }
  0x1a   :  { %159 = vmatpush.bf16.msra.mxu1 %v249_v5 }
  0x95   :  { %v116_v9 = vpop.f32.mrf.mxu0 }
  0x96   :  { %v117_v10 = vadd.f32 %v258_v7, %v116_v9 }
  0x98   :  { %v124_v11 = vmul.f32 1.3333334, %v117_v10 }
  0x9a   :  { %v125_v12 = vsel %vm123_vm2, %v124_v11, 0.0 }
  0x9b   :  { %v126_v13 = vmax.f32 %v125_v12, 0.0 }
  0x9d   :  { %v127_v14 = vpack.c.bf16 %v126_v13, %v126_v13  ;;  %v118_v15 = vpop.f32.mrf.mxu0 }
  0x9f   :  { %245 = vmatmul.msk.bf16.vlgmr.msra.gmra.mxu1 %vm148_vm3, %v127_v14 }
 0x11c   :  { %v161_v19 = vpop.f32.mrf.mxu1 }
 0x11d   :  { %v162_v20 = vadd.f32 %v259_v17, %v161_v19 }
 0x11f   :  { %v169_v21 = vmul.f32 1.3333334, %v162_v20 }
 0x121   :  { %v170_v22 = vsel %vm168_vm4, %v169_v21, 0.0 }
 0x122   :  { %v171_v23 = vmax.f32 %v170_v22, 0.0 }
 0x124   :  { %v163_v24 = vpop.f32.mrf.mxu1  ;;  %v173_v25 = vpack.c.bf16 %v171_v23, %v171_v23 }
 0x126   :  { %v180_v26 = vsel %vm148_vm3, %v173_v25, 0 }
 0x127   :  { %189 = vmatpush.bf16.xpose.msra.mxu2 %v180_v26 }
 0x12e   :  { %247 = vmatmul.msk.bf16.vlgmr.msra.gmra.mxu2 %vm148_vm3, %v172_v27 }
 0x1b1   :  { %v191_v29 = vpop.f32.mrf.mxu2 }
 0x1b2   :  { %v192_v30 = vadd.f32 %v191_v29, %v175_v28 }
 0x1b4   :  { %v248_v31 = vmul.f32 -1.442695, %v192_v30 }
 0x1b6   :  { %260 = vpow2.f32 %v248_v31 }
 0x1b9   :  { %v193_v32 = vpop.f32.mrf.mxu2 }
 0x1bc   :  { %v261_v33 = vpop.eup %260 }
 0x1bd   :  { %v198_v34 = vadd.f32 1.0, %v261_v33 }
 0x1bf   :  { %262 = vrcp.f32 %v198_v34  ;;  %v210_v38 = vand.u32 2147483648, %v198_v34  ;;  %v208_v40 = vand.u32 2147483647, %v198_v34  ;;  %vm204_vm6 = vweird.f32 %v198_v34 }
 0x1c1   :  { %v211_v42 = vor.u32 1.1754944e-38, %v210_v38  ;;  %vm209_vm9 = vcmp.eq.f32.partialorder %v208_v40, 8.507059e+37 }
 0x1c5   :  { %v263_v35 = vpop.eup %262 }
 0x1c6   :  { %v200_v36 = vmul.f32 %v263_v35, %v198_v34  ;;  %vm205_vm5 = vweird.f32 %v263_v35 }
 0x1c7   :  { %vm206_vm7 = vmor %vm204_vm6, %vm205_vm5 }
 0x1c8   :  { %v201_v37 = vsub.f32 1.0, %v200_v36 }
 0x1ca   :  { %v202_v39 = vmul.f32 %v263_v35, %v201_v37 }
 0x1cc   :  { %v203_v41 = vadd.f32 %v263_v35, %v202_v39 }
 0x1ce   :  { %v207_v43 = vsel %vm206_vm7, %v263_v35, %v203_v41 }
 0x1cf   :  { %v212_v44 = vsel %vm209_vm9, %v211_v42, %v207_v43 }
 0x1d0   :  { %215 = vst.msk [vmem:[#allocation11] sm:$0x1] %vm214_vm8, %v212_v44 }
 0x1d1   :  { %226 = dma.vmem_to_hbm [thread:$0]  %s222_s13, 16, %s224_s8, [#allocation5]  }
 0x1d2   :  { %390 = dma.done.wait [#allocation5], 16  }
 0x1d3   :  { %391 = vsyncadd [#allocation5], 4294967280 }
 0x1d4   :  { %231 = vsyncpa [#allocation4], 1 }
 0x1d5   :  { %232 = vsyncpa [#allocation7], 1 }
 0x1d6   :  { %233 = vsyncpa [#allocation10], 1 }
 0x1d7   :  { %234 = vsyncpa [#allocation5], 1 }

</bundles_post_ra>
